<compile_context>
chip_gen: v5e
topology: v5e:2x2
jax: 0.10.0
libtpu: 0.0.40
codegen_flags: <defaults>
</compile_context>

<pallas_src>
import jax
import jax.numpy as jnp
from jax import lax
from jax.experimental import pallas as pl
from jax.experimental.pallas import tpu as pltpu


def _round_up(v, m):
    return ((v + m - 1) // m) * m


def _pick_tile(dim, target, quantum):
    """Largest multiple of `quantum` that divides `dim` and is <= target.

    `dim` is always pre-padded to a multiple of `quantum`, so a bounded tile
    always exists (worst case = quantum)."""
    if dim <= target:
        return dim
    t = (target // quantum) * quantum
    while t >= quantum:
        if dim % t == 0:
            return t
        t -= quantum
    return dim


# ----------------------------------------------------------------------------
# Encoder kernel: Y = relu(X @ W + b)  -- tiled, K-reduction grid, f32 accum.
# ----------------------------------------------------------------------------
def _encoder_kernel(x_ref, w_ref, b_ref, o_ref, acc_ref):
    k = pl.program_id(2)

    @pl.when(k == 0)
    def _():
        acc_ref[...] = jnp.zeros_like(acc_ref)

    # bf16 MXU inputs, f32 accumulation.
    acc_ref[...] += jnp.dot(
        x_ref[...].astype(jnp.bfloat16),
        w_ref[...].astype(jnp.bfloat16),
        preferred_element_type=jnp.float32,
    )

    # Bias + ReLU once, in the epilogue (keeps VALU/vst out of the K loop).
    @pl.when(k == pl.num_programs(2) - 1)
    def _():
        y = acc_ref[...] + b_ref[...]
        o_ref[...] = jnp.maximum(y, 0.0).astype(o_ref.dtype)


def encode(x_flat, w, b, *, tm=256, tn=256, tk=1024, out_dtype=jnp.bfloat16):
    """x_flat: (N, F) f32, w: (F, D) (e.g. bf16), b: (1, D) f32 -> (N, D) out_dtype."""
    N, F = x_flat.shape
    D = w.shape[1]

    # Pad to hardware quanta so tiles stay bounded for arbitrary image shapes.
    # Padded features / rows / columns are zero -> the valid region of the
    # result is unchanged; padding is sliced off below.  (No-op for demo dims.)
    N_p, F_p, D_p = _round_up(N, 16), _round_up(F, 128), _round_up(D, 128)
    if (N_p, F_p) != (N, F):
        x_flat = jnp.pad(x_flat, ((0, N_p - N), (0, F_p - F)))
    if (F_p, D_p) != (F, D):
        w = jnp.pad(w, ((0, F_p - F), (0, D_p - D)))
    if D_p != D:
        b = jnp.pad(b, ((0, 0), (0, D_p - D)))

    tm = _pick_tile(N_p, tm, 16)    # 16: bf16-friendly sublane quantum
    tn = _pick_tile(D_p, tn, 128)   # lane quantum
    tk = _pick_tile(F_p, tk, 128)

    # Give the parallel i axis >= 2 steps when possible so both v7x
    # TensorCores get work (harmless extra step on v5e/v6e).
    if N_p // tm < 2 and N_p >= 32 and (N_p // 2) % 16 == 0:
        tm = N_p // 2

    grid = (N_p // tm, D_p // tn, F_p // tk)

    out = pl.pallas_call(
        _encoder_kernel,
        out_shape=jax.ShapeDtypeStruct((N_p, D_p), out_dtype),
        grid=grid,
        in_specs=[
            pl.BlockSpec((tm, tk), lambda i, j, k: (i, k)),
            pl.BlockSpec((tk, tn), lambda i, j, k: (k, j)),
            pl.BlockSpec((1, tn), lambda i, j, k: (0, j)),
        ],
        out_specs=pl.BlockSpec((tm, tn), lambda i, j, k: (i, j)),
        scratch_shapes=[pltpu.VMEM((tm, tn), jnp.float32)],
        compiler_params=pltpu.CompilerParams(
            dimension_semantics=("parallel", "parallel", "arbitrary"),
            # Working set (2x X + 2x W + acc + 2x out tiles) is ~3-4 MiB at
            # the default tiles; 32 MiB leaves ample headroom on v7x (64 MiB
            # physical) and raises v5e's 16 MiB scoped default.
            vmem_limit_bytes=32 * 1024 * 1024,
        ),
    )(x_flat, w, b)

    if (N_p, D_p) != (N, D):
        out = out[:N, :D]
    return out


# ----------------------------------------------------------------------------
# Matching kernel (a block of Bb batch elements per grid step):
#   normalize support / query embeddings (x / (||x|| + 1e-8), as in torch)
#   sim  = q_norm @ s_norm^T      (contract last dims, no explicit transpose)
#   attn = softmax(sim, axis=-1)
#   out  = attn @ support         (un-normalized support, as in torch)
# MXU operands are bf16, all accumulation / normalization math is f32.
# ----------------------------------------------------------------------------
def _matching_kernel(s_ref, q_ref, o_ref):
    s_b = s_ref[...]                                  # (Bb, Ns, D) bf16
    q_b = q_ref[...]                                  # (Bb, Nq, D) bf16
    s = s_b.astype(jnp.float32)
    q = q_b.astype(jnp.float32)

    # L2 normalization exactly as the reference: x / (||x||_2 + 1e-8).
    s_n = s / (jnp.sqrt(jnp.sum(s * s, axis=-1, keepdims=True)) + 1e-8)
    q_n = q / (jnp.sqrt(jnp.sum(q * q, axis=-1, keepdims=True)) + 1e-8)

    # Batched similarity: contract the embedding dims directly (bf16 MXU).
    sim = lax.dot_general(
        q_n.astype(jnp.bfloat16), s_n.astype(jnp.bfloat16),
        dimension_numbers=(((2,), (2,)), ((0,), (0,))),
        preferred_element_type=jnp.float32,
    )                                                 # (Bb, Nq, Ns)

    # Numerically-stable softmax along the support axis (EUP approx recip).
    sim_max = jnp.max(sim, axis=-1, keepdims=True)
    e = jnp.exp(sim - sim_max)
    attn = e * pl.reciprocal(jnp.sum(e, axis=-1, keepdims=True), approx=True)

    o_ref[...] = lax.dot_general(
        attn.astype(jnp.bfloat16), s_b,
        dimension_numbers=(((2,), (1,)), ((0,), (0,))),
        preferred_element_type=jnp.float32,
    ).astype(o_ref.dtype)                             # (Bb, Nq, D)


def matching_head(x_support, x_query):
    """x_support: (B, Ns, D), x_query: (B, Nq, D) -> logits (B, Nq, D) f32."""
    B, Ns, D = x_support.shape
    _, Nq, _ = x_query.shape

    # As few grid steps as possible (head is latency/overhead-bound), but two
    # parallel steps when the batch splits evenly so v7x megacore can use
    # both TensorCores.
    bb = B // 2 if (B >= 2 and B % 2 == 0) else B
    grid = (B // bb,)

    return pl.pallas_call(
        _matching_kernel,
        out_shape=jax.ShapeDtypeStruct((B, Nq, D), jnp.float32),
        grid=grid,
        in_specs=[
            pl.BlockSpec((bb, Ns, D), lambda i: (i, 0, 0)),
            pl.BlockSpec((bb, Nq, D), lambda i: (i, 0, 0)),
        ],
        out_specs=pl.BlockSpec((bb, Nq, D), lambda i: (i, 0, 0)),
        compiler_params=pltpu.CompilerParams(
            dimension_semantics=("parallel",),
        ),
    )(x_support, x_query)


# ----------------------------------------------------------------------------
# Full forward: mirrors MatchingNetwork.forward
# ----------------------------------------------------------------------------
def matching_network_forward(x_support, x_query, enc_w, enc_b):
    support_shape = x_support.shape[:-3]          # (B, Ns)
    query_shape = x_query.shape[:-3]              # (B, Nq)
    image_shape = x_support.shape[-3:]            # (C, H, W)
    feat = image_shape[0] * image_shape[1] * image_shape[2]

    xs = x_support.reshape(-1, feat)              # flatten NCHW images
    xq = x_query.reshape(-1, feat)
    n_support = xs.shape[0]

    # Single encoder call over the stacked [support; query] rows (identical
    # to torch.cat): the F x D weight is streamed from HBM exactly once and
    # the i grid axis gets enough parallel steps for both v7x TensorCores.
    x_all = jnp.concatenate([xs, xq], axis=0)

    D = enc_w.shape[1]
    emb = encode(x_all, enc_w, enc_b)             # (B*Ns + B*Nq, D) bf16
    s_emb = emb[:n_support].reshape(*support_shape, D)   # (B, Ns, D)
    q_emb = emb[n_support:].reshape(*query_shape, D)     # (B, Nq, D)

    return matching_head(s_emb, q_emb)            # (B, Nq, D)


if __name__ == "__main__":
    # small, deterministic example shapes
    B, Ns, Nq = 2, 8, 8
    C, H, W = 4, 16, 16
    D = 128                                       # lane-dense embedding dim
    F = C * H * W

    key = jax.random.PRNGKey(0)
    k1, k2, k3, k4 = jax.random.split(key, 4)

    x_support = jax.random.normal(k1, (B, Ns, C, H, W), dtype=jnp.float32)
    x_query = jax.random.normal(k2, (B, Nq, C, H, W), dtype=jnp.float32)

    # deterministic encoder parameters (Linear F -> D), weight stored in bf16
    enc_w = (jax.random.normal(k3, (F, D), dtype=jnp.float32)
             / jnp.sqrt(F)).astype(jnp.bfloat16)
    enc_b = jax.random.normal(k4, (1, D), dtype=jnp.float32) * 0.01

    logits = matching_network_forward(x_support, x_query, enc_w, enc_b)
    jax.block_until_ready(logits)

    # Sanity check vs. a pure-JAX reference.  The reference mirrors the
    # encoder's accuracy contract (bf16 MXU operands, bf16 stored embeddings)
    # but runs the matching head fully in f32.
    def ref_forward(xs, xq, w, b):
        xs_f = xs.reshape(-1, F)
        xq_f = xq.reshape(-1, F)
        x_all = jnp.concatenate([xs_f, xq_f], axis=0)
        emb = jnp.dot(x_all.astype(jnp.bfloat16), w.astype(jnp.bfloat16),
                      preferred_element_type=jnp.float32) + b
        emb = jnp.maximum(emb, 0.0).astype(jnp.bfloat16).astype(jnp.float32)
        s = emb[: B * Ns].reshape(B, Ns, D)
        q = emb[B * Ns:].reshape(B, Nq, D)
        s_n = s / (jnp.linalg.norm(s, axis=-1, keepdims=True) + 1e-8)
        q_n = q / (jnp.linalg.norm(q, axis=-1, keepdims=True) + 1e-8)
        sim = jnp.einsum("bqd,bsd->bqs", q_n, s_n)
        attn = jax.nn.softmax(sim, axis=-1)
        return jnp.einsum("bqs,bsd->bqd", attn, s)

    ref = ref_forward(x_support, x_query, enc_w, enc_b)
    assert logits.shape == (B, Nq, D)
    max_err = float(jnp.max(jnp.abs(logits - ref)))
    assert jnp.allclose(logits, ref, atol=2e-2, rtol=2e-2), max_err

    print("KERNEL_OK")
</pallas_src>

<mosaic_0001>
module attributes {stable_mosaic.version = 11 : i64} {
  func.func @_encoder_kernel(%arg0: i32, %arg1: i32, %arg2: i32, %arg3: memref<16x1024xf32, #tpu.memory_space<vmem>>, %arg4: memref<1024x128xbf16, #tpu.memory_space<vmem>>, %arg5: memref<1x128xf32, #tpu.memory_space<vmem>>, %arg6: memref<16x128xbf16, #tpu.memory_space<vmem>>, %arg7: memref<16x128xf32, #tpu.memory_space<vmem>>) attributes {dimension_semantics = [#tpu.dimension_semantics<parallel>, #tpu.dimension_semantics<parallel>, #tpu.dimension_semantics<arbitrary>], iteration_bounds = array<i64: 2, 1, 1>, scalar_prefetch = 0 : i64, scratch_operands = 1 : i64, tpu.core_type = #tpu.core_type<tc>, window_params = [{transform_indices = @transform_0, window_bounds = array<i64: 16, 1024>}, {transform_indices = @transform_1, window_bounds = array<i64: 1024, 128>}, {transform_indices = @transform_2, window_bounds = array<i64: 1, 128>}, {transform_indices = @transform_3, window_bounds = array<i64: 16, 128>}]} {
    %c0_i32 = arith.constant 0 : i32
    %0 = arith.cmpi eq, %arg2, %c0_i32 : i32
    %1 = arith.extui %0 : i1 to i32
    %c0_i32_0 = arith.constant 0 : i32
    %2 = arith.cmpi ne, %1, %c0_i32_0 : i32
    scf.if %2 {
      %cst_10 = arith.constant 0.000000e+00 : f32
      %13 = vector.broadcast %cst_10 : f32 to vector<16x128xf32>
      %c0_11 = arith.constant 0 : index
      %c0_12 = arith.constant 0 : index
      %14 = vector.load %arg7[%c0_11, %c0_12] : memref<16x128xf32, #tpu.memory_space<vmem>>, vector<16x128xf32>
      tpu.vector_store %arg7[%c0_11, %c0_12], %13 {strides = array<i32>} : memref<16x128xf32, #tpu.memory_space<vmem>>, vector<16x128xf32>,
    } else {
    }
    %c0 = arith.constant 0 : index
    %c0_1 = arith.constant 0 : index
    %3 = vector.load %arg7[%c0, %c0_1] : memref<16x128xf32, #tpu.memory_space<vmem>>, vector<16x128xf32>
    %c0_2 = arith.constant 0 : index
    %c0_3 = arith.constant 0 : index
    %4 = vector.load %arg3[%c0_2, %c0_3] : memref<16x1024xf32, #tpu.memory_space<vmem>>, vector<16x1024xf32>
    %5 = arith.truncf %4 : vector<16x1024xf32> to vector<16x1024xbf16>
    %c0_4 = arith.constant 0 : index
    %c0_5 = arith.constant 0 : index
    %6 = vector.load %arg4[%c0_4, %c0_5] : memref<1024x128xbf16, #tpu.memory_space<vmem>>, vector<1024x128xbf16>
    %cst = arith.constant dense<0.000000e+00> : vector<16x128xf32>
    %7 = tpu.matmul %5, %6, %cst {dimension_numbers = #tpu.dot_dimension_numbers<[1], [0], [0], [1], [0, 0, 1, 1], [], []>} : vector<16x1024xbf16>, vector<1024x128xbf16>, vector<16x128xf32> -> vector<16x128xf32>
    %8 = arith.addf %3, %7 : vector<16x128xf32>
    %c0_6 = arith.constant 0 : index
    %c0_7 = arith.constant 0 : index
    %9 = vector.load %arg7[%c0_6, %c0_7] : memref<16x128xf32, #tpu.memory_space<vmem>>, vector<16x128xf32>
    tpu.vector_store %arg7[%c0_6, %c0_7], %8 {strides = array<i32>} : memref<16x128xf32, #tpu.memory_space<vmem>>, vector<16x128xf32>,
    %c0_i32_8 = arith.constant 0 : i32
    %10 = arith.cmpi eq, %arg2, %c0_i32_8 : i32
    %11 = arith.extui %10 : i1 to i32
    %c0_i32_9 = arith.constant 0 : i32
    %12 = arith.cmpi ne, %11, %c0_i32_9 : i32
    scf.if %12 {
      %c0_10 = arith.constant 0 : index
      %c0_11 = arith.constant 0 : index
      %13 = vector.load %arg7[%c0_10, %c0_11] : memref<16x128xf32, #tpu.memory_space<vmem>>, vector<16x128xf32>
      %c0_12 = arith.constant 0 : index
      %c0_13 = arith.constant 0 : index
      %14 = vector.load %arg5[%c0_12, %c0_13] : memref<1x128xf32, #tpu.memory_space<vmem>>, vector<1x128xf32>
      %15 = vector.broadcast %14 : vector<1x128xf32> to vector<16x128xf32>
      %16 = arith.addf %13, %15 : vector<16x128xf32>
      %cst_14 = arith.constant 0.000000e+00 : f32
      %17 = vector.broadcast %cst_14 : f32 to vector<16x128xf32>
      %18 = arith.maximumf %16, %17 : vector<16x128xf32>
      %19 = arith.truncf %18 : vector<16x128xf32> to vector<16x128xbf16>
      %c0_15 = arith.constant 0 : index
      %c0_16 = arith.constant 0 : index
      %20 = vector.load %arg6[%c0_15, %c0_16] : memref<16x128xbf16, #tpu.memory_space<vmem>>, vector<16x128xbf16>
      tpu.vector_store %arg6[%c0_15, %c0_16], %19 {strides = array<i32>} : memref<16x128xbf16, #tpu.memory_space<vmem>>, vector<16x128xbf16>,
    } else {
    }
    return
  }
  func.func @transform_0(%arg0: i32, %arg1: i32, %arg2: i32) -> (i32, i32) {
    %c0_i32 = arith.constant 0 : i32
    return %arg0, %arg2 : i32, i32
  }
  func.func @transform_1(%arg0: i32, %arg1: i32, %arg2: i32) -> (i32, i32) {
    %c0_i32 = arith.constant 0 : i32
    return %arg2, %arg1 : i32, i32
  }
  func.func @transform_2(%arg0: i32, %arg1: i32, %arg2: i32) -> (i32, i32) {
    %c0_i32 = arith.constant 0 : i32
    %c0_i32_0 = arith.constant 0 : i32
    return %c0_i32, %arg1 : i32, i32
  }
  func.func @transform_3(%arg0: i32, %arg1: i32, %arg2: i32) -> (i32, i32) {
    %c0_i32 = arith.constant 0 : i32
    return %arg0, %arg1 : i32, i32
  }
}

</mosaic_0001>

<bundles_post_ra>
// kernel: tpu_custom_call.1
= control target key start
LH: loop header
LB: loop body
LE: loop exit
PB: predicated region body
PF: predicated region fallthrough
CT: control target
= control target key end

     0   :  { %s1846_s0 = inlined_call_operand.hbm [shape: f32[32,1024], index: 0, kind: input, shape index: {}]   ;;  %s1847_s1 = inlined_call_operand.hbm [shape: bf16[1024,128], index: 1, kind: input, shape index: {}]   ;;  %s1848_s2 = inlined_call_operand.vmem [shape: f32[1,128], index: 2, kind: input, shape index: {}]   ;;  %s1849_s3 = inlined_call_operand.hbm [shape: bf16[32,128], index: 3, kind: output, shape index: {}]  }
   0x1   :  { %1851 = sst [smem:[#allocation12_spill]] %s1847_s1 }
   0x2   :  { %8 = vsyncpa [#allocation4], 0 }
   0x3   :  { %10 = vsyncpa [#allocation4 + $0x1], 0 }
   0x4   :  { %11 = vsyncpa [#allocation7], 0 }
   0x5   :  { %12 = vsyncpa [#allocation5], 0 }
   0x6   :  { %14 = vsyncpa [#allocation5 + $0x1], 0  ;;  %s1672_s12 = smov 0   ;;  %s1674_s13 = smov 0  }
   0x7   :  { %s1676_s14 = smov 0   ;;  %s1678_s15 = smov 0  }
   0x8   :  { %s1680_s16 = smov 0   ;;  %s1682_s17 = smov 0  }
   0x9 LB: > { %s1072_s18 = sadd.s32 4294967295, %s1644_s17   ;;  %s1073_s19 = sadd.s32 4294967294, %s1644_s17   ;;  %s1644_s17 = sphi %s1682_s17, %s20_s17   ;;  %s1640_s16 = sphi %s1680_s16, %s1865_s16   ;;  %s1636_s15 = sphi %s1678_s15, %s1864_s15   ;;  %s1632_s14 = sphi %s1676_s14, %s1863_s14   ;;  %s1628_s13 = sphi %s1674_s13, %s1862_s13   ;;  %s1624_s12 = sphi %s1672_s12, %s1861_s12  }
   0xa   : > { %p61_p0 = scmp.ne.s32.totalorder %s1628_s13, %s1624_s12  ;;  %p1706_p1 = scmp.eq.s32.totalorder %s1072_s18, 0 }
   0xb   : > { %p1710_p2 = scmp.eq.s32.totalorder %s1072_s18, 1  ;;  %p147_p3 = scmp.eq.s32.totalorder %s1073_s19, 1 }
   0xc   : > { %p1716_p4 = por %p1706_p1, %p61_p0  ;;  %p1074_p5 = scmp.ge.s32.totalorder %s1644_s17, 1 }
   0xd   : > { %p1721_p6 = por %p147_p3, %p61_p0  ;;  %p154_p7 = scmp.lt.s32.totalorder %s1644_s17, 3 }
   0xe   : > { %s1856_s1 = sld [smem:[#allocation12_spill]]  ;;  %s1646_s28 = smov [#allocation6]  }
   0xf   : > { %p1729_p8 = pnand %p1074_p5, %p154_p7  ;;  %s171_s29 = sshll.u32 %s1646_s28, 4  ;;  %s172_s29 = int_to_ptr.vmem [resolvable:$true] %s171_s29 }
  0x10   : > { %p1077_p11 = scmp.ge.s32.totalorder %s1644_s17, 2  ;;  %s1850_s30 = smov 64  }
  0x11   : > { %p1427_p9 = pneg %p1729_p8  ;;  %s1648_s4 = smov 4  }
  0x12   : > { %s39_s5 = sadd.s32 1, %s1640_s16  ;;  %s48_s6 = sadd.s32 1, %s1632_s14 }
  0x13   : > { %p1428_p10 = pnand %p1427_p9, %p1706_p1  ;;  %p41_p12 = scmp.ge.s32.totalorder %s39_s5, 2 }
  0x14   : > { %s169_s26 = sshll.u32 %s1856_s1, 4  ;;  %p55_p13 = scmp.ne.s32.totalorder %s1632_s14, %s1628_s13  ;;  %s170_s26 = int_to_ptr.hbm [resolvable:$true] %s169_s26 }
  0x15   : > { %1430 = dma.hbm_to_vmem [thread:$0]  (!%p1428_p10), %s170_s26, 8192, %s172_s29, [#allocation7], %s1850_s30, %s1850_s30, %s1648_s4  }
  0x16   : > { %p56_p0 = scmp.eq.s32.totalorder %s1644_s17, 0  ;;  %s1867_s5 = smov (%p41_p12, %s39_s5), 0 }
  0x17   : > { %p1753_p5 = por %p1710_p2, %p55_p13  ;;  %s43_s9 = ssub.s32 %s1640_s16, %s1867_s5 }
  0x18   : > { %p1747_p3 = por %p56_p0, %p55_p13  ;;  %p1440_p7 = scmp.lt.s32.totalorder %s1644_s17, 2 }
  0x19   : > { %p46_p9 = scmp.eq.s32.totalorder %s43_s9, 0  ;;  %s191_s10 = sand.u32 1, %s1632_s14  }
  0x1a   : > { %s1078_s11 = sshll.u32 %s191_s10, 7  ;;  %s1348_s19 = sshll.u32 %s1640_s16, 7 }
  0x1b   : > { %s1762_s18 = scalar_select %p46_p9, %s1632_s14, %s48_s6  }
  0x1c   : > { %s203_s26 = scalar_lea.hbm %s1846_s0, %s1348_s19  ;;  %s195_s28 = scalar_lea.vmem [#allocation3], %s1078_s11 }
  0x1d   : > { %s206_s29 = sshll.u32 %s195_s28, 4  ;;  %s204_s21 = sshll.u32 %s203_s26, 4  ;;  %s207_s29 = int_to_ptr.vmem [resolvable:$true] %s206_s29  ;;  %s205_s21 = int_to_ptr.hbm [resolvable:$true] %s204_s21 }
  0x1e   : > { %p1432_p2 = pnand %p1440_p7, %p1747_p3  ;;  %s192_s4 = scalar_lea.sflag [#allocation4], %s191_s10 }
  0x1f   : > { %s1649_s30 = smov 1024   ;;  %s1860_s1 = smov 64  }
  0x20   : > { %1434 = dma.hbm_to_vmem [thread:$0]  (!%p1432_p2), %s205_s21, 2048, %s207_s29, %s192_s4, %s1649_s30, %s1649_s30, %s1860_s1  }
  0x21   : > { %218 = sbr.rel (%p1729_p8) target bundleno = 261 (0x105), region = 32  ;;  %s1774_s6 = sand.u32 (!%p1729_p8), 1, %s1628_s13  }
  0x22   : > { %s1083_s9 = sshll.u32 (!%p1729_p8), %s1774_s6, 7  ;;  %s221_s11 = scalar_lea.sflag (!%p1729_p8), [#allocation4], %s1774_s6 }
  0x23   : > { %s1778_s19 = scalar_lea.vmem (!%p1729_p8), [#allocation3], %s1083_s9 }
  0x26   : > { %1611 = dma.done.wait (%p1716_p4), %s221_s11, 2048  }
  0x27   : > { %1613 = vsyncadd (%p1716_p4), %s221_s11, 4294965248 }
  0x28   : > { %1615 = dma.done.wait (%p1706_p1), [#allocation7], 8192  }
  0x29   : > { %1617 = vsyncadd (%p1706_p1), [#allocation7], 4294959104  ;;  %v1356_v0 = vld [vmem:[#allocation6 + $0x38] sm:$0xff]  ;;  %v1355_v4 = vld [vmem:[#allocation6 + $0x30] sm:$0xff]  ;;  %s1085_s22 = sshll.u32 %s1774_s6, 3  ;;  %s1413_s27 = sshll.u32 %s1636_s15, 3 }
  0x2a   : > { %v1364_v1 = vld [vmem:[#allocation6 + $0x78] sm:$0xff]  ;;  %807 = vmatpush.bf16.msra.mxu0 %v1356_v0  ;;  %v1363_v5 = vld [vmem:[#allocation6 + $0x70] sm:$0xff]  ;;  %v1354_v8 = vld [vmem:[#allocation6 + $0x28] sm:$0xff]  ;;  %s953_s10 = scalar_lea.hbm %s1849_s3, %s1413_s27  ;;  %s255_s24 = scalar_lea.vmem [#allocation8], %s1085_s22 }
  0x2b   : > { %v1372_v2 = vld [vmem:[#allocation6 + $0xb8] sm:$0xff]  ;;  %821 = vmatpush.bf16.msra.mxu1 %v1364_v1  ;;  %v1371_v6 = vld [vmem:[#allocation6 + $0xb0] sm:$0xff]  ;;  %v1362_v9 = vld [vmem:[#allocation6 + $0x68] sm:$0xff]  ;;  %s954_s25 = sshll.u32 %s255_s24, 4  ;;  %s956_s26 = sshll.u32 %s953_s10, 4  ;;  %s955_s25 = int_to_ptr.vmem [resolvable:$true] %s954_s25  ;;  %s957_s26 = int_to_ptr.hbm [resolvable:$true] %s956_s26 }
  0x2c   : > { %v1380_v3 = vld [vmem:[#allocation6 + $0xf8] sm:$0xff]  ;;  %835 = vmatpush.bf16.msra.mxu2 %v1372_v2  ;;  %v1379_v7 = vld [vmem:[#allocation6 + $0xf0] sm:$0xff]  ;;  %v1370_v10 = vld [vmem:[#allocation6 + $0xa8] sm:$0xff]  ;;  %s941_s15 = scalar_lea.sflag [#allocation5], %s1774_s6  ;;  %s1572_s28 = sshra.s32 %s957_s26, 4  ;;  %s1573_s28 = int_to_ptr.hbm [resolvable:$true] %s1572_s28 }
  0x2d   : > { %849 = vmatpush.bf16.msra.mxu3 %v1380_v3  ;;  %v1378_v11 = vld [vmem:[#allocation6 + $0xe8] sm:$0xff]  ;;  %v1353_v12 = vld [vmem:[#allocation6 + $0x20] sm:$0xff]  ;;  %v1352_v16 = vld [vmem:[#allocation6 + $0x18] sm:$0xff]  ;;  %s1574_s29 = scalar_lea.hbm %s1573_s28, 8  ;;  %s1578_s9 = scalar_lea.hbm %s1849_s3, 16 }
  0x2e   : > { %808 = vmatpush.bf16.msra.mxu0 %v1355_v4  ;;  %v1361_v13 = vld [vmem:[#allocation6 + $0x60] sm:$0xff]  ;;  %v1360_v17 = vld [vmem:[#allocation6 + $0x58] sm:$0xff]  ;;  %v1351_v20 = vld [vmem:[#allocation6 + $0x10] sm:$0xff]  ;;  %p1575_p1 = scmp.ne.s32.totalorder %s1573_s28, %s1574_s29  ;;  %p1579_p10 = scmp.lt.s32.totalorder %s1573_s28, %s1849_s3 }
  0x2f   : > { %822 = vmatpush.bf16.msra.mxu1 %v1363_v5  ;;  %v1369_v14 = vld [vmem:[#allocation6 + $0xa0] sm:$0xff]  ;;  %v1368_v18 = vld [vmem:[#allocation6 + $0x98] sm:$0xff]  ;;  %v1359_v21 = vld [vmem:[#allocation6 + $0x50] sm:$0xff]  ;;  %p1580_p12 = scmp.lt.s32.totalorder %s1578_s9, %s1574_s29 }
  0x30   : > { %836 = vmatpush.bf16.msra.mxu2 %v1371_v6  ;;  %v1377_v15 = vld [vmem:[#allocation6 + $0xe0] sm:$0xff]  ;;  %v1376_v19 = vld [vmem:[#allocation6 + $0xd8] sm:$0xff]  ;;  %v1367_v22 = vld [vmem:[#allocation6 + $0x90] sm:$0xff]  ;;  %p1576_p4 = pnand %p1575_p1, %p1753_p5 }
  0x31   : > { %850 = vmatpush.bf16.msra.mxu3 %v1379_v7  ;;  %v1375_v23 = vld [vmem:[#allocation6 + $0xd0] sm:$0xff]  ;;  %v1350_v24 = vld [vmem:[#allocation6 + $0x8] sm:$0xff]  ;;  %v1349_v28 = vld [vmem:[#allocation6] sm:$0xff]  ;;  %p1581_p13 = por %p1580_p12, %p1579_p10 }
  0x32   : > { %809 = vmatpush.bf16.msra.mxu0 %v1354_v8  ;;  %v1358_v25 = vld [vmem:[#allocation6 + $0x48] sm:$0xff]  ;;  %v1357_v29 = vld [vmem:[#allocation6 + $0x40] sm:$0xff]  ;;  %v1388_v32 = vld [vmem:[#allocation6 + $0x138] sm:$0xff]  ;;  %p1577_p8 = pneg %p1576_p4 }
  0x33   : > { %823 = vmatpush.bf16.msra.mxu1 %v1362_v9  ;;  %v1366_v26 = vld [vmem:[#allocation6 + $0x88] sm:$0xff]  ;;  %v1365_v30 = vld [vmem:[#allocation6 + $0x80] sm:$0xff]  ;;  %v1396_v33 = vld [vmem:[#allocation6 + $0x178] sm:$0xff] }
  0x34   : > { %837 = vmatpush.bf16.msra.mxu2 %v1370_v10  ;;  %v1374_v27 = vld [vmem:[#allocation6 + $0xc8] sm:$0xff]  ;;  %v1373_v31 = vld [vmem:[#allocation6 + $0xc0] sm:$0xff]  ;;  %v273_v34 = vld [vmem:[%s1778_s19 + $0x10] sm:$0xff]  ;;  %p1582_p0 = pnand %p1581_p13, %p1577_p8 }
  0x35   : > { %851 = vmatpush.bf16.msra.mxu3 %v1378_v11  ;;  %v281_v35 = vld [vmem:[%s1778_s19 + $0x50] sm:$0xff]  ;;  %v274_v36 = vld [vmem:[%s1778_s19 + $0x18] sm:$0xff]  ;;  %v271_v38 = vld [vmem:[%s1778_s19] sm:$0xff] }
  0x36   : > { %810 = vmatpush.bf16.msra.mxu0 %v1353_v12  ;;  %v282_v37 = vld [vmem:[%s1778_s19 + $0x58] sm:$0xff]  ;;  %v279_v39 = vld [vmem:[%s1778_s19 + $0x40] sm:$0xff]  ;;  %v272_v40 = vld [vmem:[%s1778_s19 + $0x8] sm:$0xff]  ;;  %v289_v44 = vpack.c.bf16 %v281_v35, %v273_v34 }
  0x37   : > { %824 = vmatpush.bf16.msra.mxu1 %v1361_v13  ;;  %v280_v41 = vld [vmem:[%s1778_s19 + $0x48] sm:$0xff]  ;;  %v1404_v42 = vld [vmem:[#allocation6 + $0x1b8] sm:$0xff]  ;;  %v290_v45 = vpack.c.bf16 %v282_v37, %v274_v36  ;;  %v287_v46 = vpack.c.bf16 %v279_v39, %v271_v38  ;;  %v1387_v48 = vld [vmem:[#allocation6 + $0x130] sm:$0xff] }
  0x38   : > { %838 = vmatpush.bf16.msra.mxu2 %v1369_v14  ;;  %v1412_v43 = vld [vmem:[#allocation6 + $0x1f8] sm:$0xff]  ;;  %v288_v47 = vpack.c.bf16 %v280_v41, %v272_v40  ;;  %v1395_v49 = vld [vmem:[#allocation6 + $0x170] sm:$0xff]  ;;  %v1386_v52 = vld [vmem:[#allocation6 + $0x128] sm:$0xff] }
  0x39   : > { %852 = vmatpush.bf16.msra.mxu3 %v1377_v15  ;;  %v1403_v50 = vld [vmem:[#allocation6 + $0x1b0] sm:$0xff]  ;;  %v1394_v53 = vld [vmem:[#allocation6 + $0x168] sm:$0xff]  ;;  %v1385_v56 = vld [vmem:[#allocation6 + $0x120] sm:$0xff] }
  0x3a   : > { %811 = vmatpush.bf16.msra.mxu0 %v1352_v16  ;;  %v1411_v51 = vld [vmem:[#allocation6 + $0x1f0] sm:$0xff]  ;;  %v1402_v54 = vld [vmem:[#allocation6 + $0x1a8] sm:$0xff]  ;;  %v1393_v57 = vld [vmem:[#allocation6 + $0x160] sm:$0xff] }
  0x3b   : > { %825 = vmatpush.bf16.msra.mxu1 %v1360_v17  ;;  %v1410_v55 = vld [vmem:[#allocation6 + $0x1e8] sm:$0xff]  ;;  %v1401_v58 = vld [vmem:[#allocation6 + $0x1a0] sm:$0xff]  ;;  %v1384_v60 = vld [vmem:[#allocation6 + $0x118] sm:$0xff] }
  0x3c   : > { %839 = vmatpush.bf16.msra.mxu2 %v1368_v18  ;;  %v1409_v59 = vld [vmem:[#allocation6 + $0x1e0] sm:$0xff]  ;;  %v1392_v61 = vld [vmem:[#allocation6 + $0x158] sm:$0xff]  ;;  %v1383_v0 = vld [vmem:[#allocation6 + $0x110] sm:$0xff] }
  0x3d   : > { %853 = vmatpush.bf16.msra.mxu3 %v1376_v19  ;;  %v1400_v62 = vld [vmem:[#allocation6 + $0x198] sm:$0xff]  ;;  %v1391_v1 = vld [vmem:[#allocation6 + $0x150] sm:$0xff]  ;;  %v1382_v4 = vld [vmem:[#allocation6 + $0x108] sm:$0xff] }
  0x3e   : > { %812 = vmatpush.bf16.msra.mxu0 %v1351_v20  ;;  %v1408_v63 = vld [vmem:[#allocation6 + $0x1d8] sm:$0xff]  ;;  %v1399_v2 = vld [vmem:[#allocation6 + $0x190] sm:$0xff]  ;;  %v1390_v5 = vld [vmem:[#allocation6 + $0x148] sm:$0xff] }
  0x3f   : > { %826 = vmatpush.bf16.msra.mxu1 %v1359_v21  ;;  %v1407_v3 = vld [vmem:[#allocation6 + $0x1d0] sm:$0xff]  ;;  %v1398_v6 = vld [vmem:[#allocation6 + $0x188] sm:$0xff]  ;;  %v1381_v8 = vld [vmem:[#allocation6 + $0x100] sm:$0xff] }
  0x40   : > { %840 = vmatpush.bf16.msra.mxu2 %v1367_v22  ;;  %v1406_v7 = vld [vmem:[#allocation6 + $0x1c8] sm:$0xff]  ;;  %v1389_v9 = vld [vmem:[#allocation6 + $0x140] sm:$0xff]  ;;  %v277_v16 = vld [vmem:[%s1778_s19 + $0x30] sm:$0xff] }
  0x41   : > { %854 = vmatpush.bf16.msra.mxu3 %v1375_v23  ;;  %v1397_v10 = vld [vmem:[#allocation6 + $0x180] sm:$0xff]  ;;  %v276_v14 = vld [vmem:[%s1778_s19 + $0x28] sm:$0xff]  ;;  %v285_v17 = vld [vmem:[%s1778_s19 + $0x70] sm:$0xff] }
  0x42   : > { %813 = vmatpush.bf16.msra.mxu0 %v1350_v24  ;;  %v1405_v11 = vld [vmem:[#allocation6 + $0x1c0] sm:$0xff]  ;;  %v284_v15 = vld [vmem:[%s1778_s19 + $0x68] sm:$0xff]  ;;  %v278_v18 = vld [vmem:[%s1778_s19 + $0x38] sm:$0xff]  ;;  %v293_v22 = vpack.c.bf16 %v285_v17, %v277_v16 }
  0x43   : > { %827 = vmatpush.bf16.msra.mxu1 %v1358_v25  ;;  %v275_v12 = vld [vmem:[%s1778_s19 + $0x20] sm:$0xff]  ;;  %v286_v19 = vld [vmem:[%s1778_s19 + $0x78] sm:$0xff]  ;;  %v292_v21 = vpack.c.bf16 %v284_v15, %v276_v14 }
  0x44   : > { %841 = vmatpush.bf16.msra.mxu2 %v1366_v26  ;;  %v283_v13 = vld [vmem:[%s1778_s19 + $0x60] sm:$0xff]  ;;  %v294_v23 = vpack.c.bf16 %v286_v19, %v278_v18 }
  0x45   : > { %855 = vmatpush.bf16.msra.mxu3 %v1374_v27  ;;  %v291_v20 = vpack.c.bf16 %v283_v13, %v275_v12 }
  0x46   : > { %814 = vmatpush.bf16.msra.mxu0 %v1349_v28 }
  0x47   : > { %828 = vmatpush.bf16.msra.mxu1 %v1357_v29 }
  0x48   : > { %842 = vmatpush.bf16.msra.mxu2 %v1365_v30 }
  0x49   : > { %856 = vmatpush.bf16.msra.mxu3 %v1373_v31  ;;  %815 = vmatmul.bf16.vlgmr.msra.gmra.mxu0 %v287_v46 }
  0x4a   : > { %863 = vmatpush.bf16.msrb.mxu0 %v1388_v32  ;;  %829 = vmatmul.bf16.vlgmr.msra.gmra.mxu1 %v288_v47 }
  0x4b   : > { %877 = vmatpush.bf16.msrb.mxu1 %v1396_v33  ;;  %843 = vmatmul.bf16.vlgmr.msra.gmra.mxu2 %v289_v44 }
  0x4c   : > { %891 = vmatpush.bf16.msrb.mxu2 %v1404_v42  ;;  %857 = vmatmul.bf16.vlgmr.msra.gmra.mxu3 %v290_v45 }
  0x4d   : > { %905 = vmatpush.bf16.msrb.mxu3 %v1412_v43 }
  0x4e   : > { %864 = vmatpush.bf16.msrb.mxu0 %v1387_v48 }
  0x4f   : > { %878 = vmatpush.bf16.msrb.mxu1 %v1395_v49  ;;  %v1497_v49 = vld [vmem:[%s1848_s2] ss:$0 sm:$0xff] }
  0x50   : > { %892 = vmatpush.bf16.msrb.mxu2 %v1403_v50 }
  0x51   : > { %906 = vmatpush.bf16.msrb.mxu3 %v1411_v51 }
  0x52   : > { %865 = vmatpush.bf16.msrb.mxu0 %v1386_v52 }
  0x53   : > { %879 = vmatpush.bf16.msrb.mxu1 %v1394_v53 }
  0x54   : > { %893 = vmatpush.bf16.msrb.mxu2 %v1402_v54 }
  0x55   : > { %907 = vmatpush.bf16.msrb.mxu3 %v1410_v55 }
  0x56   : > { %866 = vmatpush.bf16.msrb.mxu0 %v1385_v56 }
  0x57   : > { %880 = vmatpush.bf16.msrb.mxu1 %v1393_v57 }
  0x58   : > { %894 = vmatpush.bf16.msrb.mxu2 %v1401_v58 }
  0x59   : > { %908 = vmatpush.bf16.msrb.mxu3 %v1409_v59 }
  0x5a   : > { %867 = vmatpush.bf16.msrb.mxu0 %v1384_v60 }
  0x5b   : > { %881 = vmatpush.bf16.msrb.mxu1 %v1392_v61 }
  0x5c   : > { %895 = vmatpush.bf16.msrb.mxu2 %v1400_v62 }
  0x5d   : > { %909 = vmatpush.bf16.msrb.mxu3 %v1408_v63 }
  0x5e   : > { %868 = vmatpush.bf16.msrb.mxu0 %v1383_v0 }
  0x5f   : > { %882 = vmatpush.bf16.msrb.mxu1 %v1391_v1 }
  0x60   : > { %896 = vmatpush.bf16.msrb.mxu2 %v1399_v2 }
  0x61   : > { %910 = vmatpush.bf16.msrb.mxu3 %v1407_v3 }
  0x62   : > { %869 = vmatpush.bf16.msrb.mxu0 %v1382_v4 }
  0x63   : > { %883 = vmatpush.bf16.msrb.mxu1 %v1390_v5 }
  0x64   : > { %897 = vmatpush.bf16.msrb.mxu2 %v1398_v6 }
  0x65   : > { %911 = vmatpush.bf16.msrb.mxu3 %v1406_v7 }
  0x66   : > { %870 = vmatpush.bf16.msrb.mxu0 %v1381_v8 }
  0x67   : > { %884 = vmatpush.bf16.msrb.mxu1 %v1389_v9 }
  0x68   : > { %898 = vmatpush.bf16.msrb.mxu2 %v1397_v10 }
  0x69   : > { %912 = vmatpush.bf16.msrb.mxu3 %v1405_v11  ;;  %871 = vmatmul.bf16.vlgmr.msrb.gmra.mxu0 %v291_v20 }
  0x6a   : > { %885 = vmatmul.bf16.vlgmr.msrb.gmra.mxu1 %v292_v21 }
  0x6b   : > { %899 = vmatmul.bf16.vlgmr.msrb.gmra.mxu2 %v293_v22 }
  0x6c   : > { %913 = vmatmul.bf16.vlgmr.msrb.gmra.mxu3 %v294_v23 }
  0xc6   : > { %v816_v24 = vpop.f32.mrf.mxu0 }
  0xc7   : > { %v830_v25 = vpop.f32.mrf.mxu1 }
  0xc8   : > { %v831_v29 = vadd.f32 %v830_v25, %v816_v24 }
  0xce   : > { %v844_v26 = vpop.f32.mrf.mxu2  ;;  %v818_v28 = vpop.f32.mrf.mxu0 }
  0xcf   : > { %v858_v27 = vpop.f32.mrf.mxu3  ;;  %v832_v30 = vpop.f32.mrf.mxu1  ;;  %v845_v31 = vadd.f32 %v844_v26, %v831_v29 }
  0xd0   : > { %v833_v34 = vadd.f32 %v832_v30, %v818_v28 }
  0xd1   : > { %v859_v36 = vadd.f32 %v858_v27, %v845_v31 }
  0xd6   : > { %v846_v32 = vpop.f32.mrf.mxu2 }
  0xd7   : > { %v860_v33 = vpop.f32.mrf.mxu3  ;;  %v847_v38 = vadd.f32 %v846_v32, %v833_v34 }
  0xd9   : > { %v861_v42 = vadd.f32 %v860_v33, %v847_v38 }
  0xe6   : > { %v872_v35 = vpop.f32.mrf.mxu0 }
  0xe7   : > { %v886_v37 = vpop.f32.mrf.mxu1  ;;  %v873_v39 = vadd.f32 %v872_v35, %v859_v36 }
  0xe9   : > { %v887_v43 = vadd.f32 %v886_v37, %v873_v39 }
  0xee   : > { %v900_v40 = vpop.f32.mrf.mxu2  ;;  %v874_v44 = vpop.f32.mrf.mxu0 }
  0xef   : > { %v914_v41 = vpop.f32.mrf.mxu3  ;;  %v901_v45 = vadd.f32 %v900_v40, %v887_v43  ;;  %v875_v46 = vadd.f32 %v874_v44, %v861_v42  ;;  %v888_v47 = vpop.f32.mrf.mxu1 }
  0xf1   : > { %v915_v48 = vadd.f32 %v914_v41, %v901_v45  ;;  %v889_v50 = vadd.f32 %v888_v47, %v875_v46 }
  0xf3   : > { %v932_v54 = vadd.f32 %v1497_v49, %v915_v48 }
  0xf5   : > { %v934_v57 = vmax.f32 %v932_v54, 0.0 }
  0xf6   : > { %v902_v51 = vpop.f32.mrf.mxu2 }
  0xf7   : > { %v903_v52 = vadd.f32 %v902_v51, %v889_v50  ;;  %v916_v53 = vpop.f32.mrf.mxu3 }
  0xf9   : > { %v917_v55 = vadd.f32 %v916_v53, %v903_v52 }
  0xfb   : > { %v933_v56 = vadd.f32 %v1497_v49, %v917_v55 }
  0xfd   : > { %v935_v58 = vmax.f32 %v933_v56, 0.0 }
  0xff   : > { %v1417_v59 = vpack.c.bf16 %v935_v58, %v934_v57 }
 0x101   : > { %1418 = vst [vmem:[%s255_s24] sm:$0xff] %v1417_v59  }
 0x102   : > { %1585 = shalt.err (!%p1582_p0)
}
 0x103   : > { %s1650_s6 = smov 64   ;;  %s1651_s1 = smov 4  }
 0x104   : > { %1425 = dma.vmem_to_hbm [thread:$0]  (%p1753_p5), %s955_s25, 128, %s957_s26, %s941_s15, %s1650_s6, %s1650_s6, %s1651_s1  }
 0x105 PF: > { %s971_s20 = sand.u32 1, %s1624_s12   ;;  %p1436_p3 = pnand %p1077_p11, %p1721_p6 }
 0x106   : > { %s972_s22 = scalar_lea.sflag [#allocation5], %s971_s20 }
 0x107   : > { %p1437_p7 = pneg %p1436_p3 }
 0x109   : > { %1619 = dma.done.wait (%p1437_p7), %s972_s22, 128  }
 0x10a   : > { %1621 = vsyncadd (%p1437_p7), %s972_s22, 4294967168  ;;  %s20_s17 = sadd.s32 1, %s1644_s17   ;;  %s1861_s12 = smov %s1628_s13 }
 0x10b   : > { %p17_p9 = scmp.ge.s32.totalorder %s20_s17, 4   ;;  %s1862_s13 = smov %s1632_s14 }
 0x10c   : > { %s1863_s14 = smov %s1762_s18  ;;  %s1864_s15 = smov %s1640_s16 }
 0x10d   : > { %s1865_s16 = smov %s1867_s5  ;;  %19 = sbr.rel (!%p17_p9) target bundleno = 9 (0x9), region = 93 }
 0x112   :  { %978 = vsyncpa [#allocation4], 1 }
 0x113   :  { %980 = vsyncpa [#allocation4 + $0x1], 1 }
 0x114   :  { %981 = vsyncpa [#allocation7], 1 }
 0x115   :  { %982 = vsyncpa [#allocation5], 1 }
 0x116   :  { %984 = vsyncpa [#allocation5 + $0x1], 1 }

</bundles_post_ra>
